<compile_context>
chip_gen: v7x
topology: tpu7x:2x2x1
jax: 0.10.0
libtpu: 0.0.40
codegen_flags: <defaults>
</compile_context>

<pallas_src>
import functools

import jax
import jax.numpy as jnp
from jax import lax
from jax.experimental import pallas as pl
from jax.experimental.pallas import tpu as pltpu


def _vmem_capacity_bytes() -> int:
    """Physical VMEM per TensorCore; conservative (v7x-sized) fallback."""
    try:
        info = pltpu.get_tpu_info()
        cap = getattr(info, "vmem_capacity_bytes", None)
        if cap:
            return int(cap)
    except Exception:
        pass
    return 64 << 20


def _vmem_budgets(vmem_cap: int) -> tuple[int, int]:
    """(per-block logits byte budget, vmem_limit_bytes) per chip generation."""
    if vmem_cap <= (64 << 20):        # v7x-class: 64 MiB physical VMEM / TC
        return 5 << 20, 40 << 20
    return 16 << 20, 96 << 20         # v5e / v6e: 128 MiB physical VMEM


def _choose_tile_b(batch: int, num_classes: int, itemsize: int,
                   block_cap: int, vmem_limit: int) -> int:
    """Pick the largest batch tile that fits the VMEM footprint budget."""
    logits_row = max(1, num_classes * itemsize)
    # Per batch-row VMEM footprint:
    #   2 x logits block (double buffered)
    #   ~3 block-sized f32/i32 temporaries (f32 cast / exp(x-m) / iota / w*x;
    #     Mosaic fuses most of these, budget 3 to be safe)
    #   2 x lane-padded (row, 1) int32 targets block (1 lane pads to 128)
    #   2 x lane-dense f32 output row
    row_bytes = 2 * logits_row + 3 * num_classes * 4 + 2 * 128 * 4 + 2 * 4
    tile = min(block_cap // logits_row,
               max(1, (vmem_limit - (4 << 20)) // row_bytes))
    align = max(8, 32 // max(1, itemsize))  # 8 rows f32, 16 bf16, 32 int8/fp8
    if tile >= batch:
        return batch                        # one block covers the whole batch
    return max(align, (tile // align) * align)


def _ce_label_smooth_kernel(logits_ref, targets_ref, loss_ref, *,
                            num_classes: int, epsilon: float):
    # logits_ref : (TILE_B, C) float (f32 or bf16) block of the logits
    # targets_ref: (TILE_B, 1) int32 class indices
    # loss_ref   : (1, 1, TILE_B) float32 per-sample loss (lane-dense)
    x = logits_ref[...].astype(jnp.float32)                      # (TB, C)
    tb, c = x.shape

    # Numerically stable logsumexp along the class axis (f32 accumulation).
    m = jnp.max(x, axis=1, keepdims=True)                        # (TB, 1)
    sum_exp = jnp.sum(jnp.exp(x - m), axis=1, keepdims=True)     # (TB, 1)
    lse = jnp.log(sum_exp) + m                                   # (TB, 1)

    # Single fused weighted reduction replacing x_t and sum_x:
    #   w_c = (1-eps)*onehot_c + eps/C   (sums to 1 per row)
    #   loss = -sum_c w_c * (x_c - lse) = lse - sum_c w_c * x_c
    labels = targets_ref[...]                                    # (TB, 1) int32
    class_ids = lax.broadcasted_iota(jnp.int32, (tb, c), 1)
    w_off = epsilon / num_classes
    w_on = (1.0 - epsilon) + w_off
    w = jnp.where(class_ids == labels, jnp.float32(w_on), jnp.float32(w_off))
    wsum = jnp.sum(x * w, axis=1, keepdims=True)                 # (TB, 1)

    loss = lse - wsum                                            # (TB, 1)
    loss_ref[0, 0, :] = loss[:, 0]                               # lane-dense store


def cross_entropy_label_smooth(inputs, targets, *, num_classes: int,
                               epsilon: float = 0.1, reduction: bool = True,
                               tile_b: int | None = None):
    """inputs: (B, num_classes) logits; targets: (B,) int class indices."""
    B, C = inputs.shape
    assert C == num_classes

    itemsize = jnp.dtype(inputs.dtype).itemsize
    block_cap, vmem_limit = _vmem_budgets(_vmem_capacity_bytes())
    if tile_b is None:
        tile_b = _choose_tile_b(B, C, itemsize, block_cap, vmem_limit)
    tile_b = max(1, min(tile_b, B))
    num_tiles = -(-B // tile_b)          # cdiv; last block may be partial

    tgt = targets.astype(jnp.int32).reshape(B, 1)
    kernel = functools.partial(_ce_label_smooth_kernel,
                               num_classes=num_classes, epsilon=epsilon)

    per_tile = pl.pallas_call(
        kernel,
        out_shape=jax.ShapeDtypeStruct((num_tiles, 1, tile_b), jnp.float32),
        grid_spec=pltpu.PrefetchScalarGridSpec(
            num_scalar_prefetch=0,
            grid=(num_tiles,),
            in_specs=[
                pl.BlockSpec((tile_b, C), lambda i: (i, 0)),   # logits tile
                pl.BlockSpec((tile_b, 1), lambda i: (i, 0)),   # targets tile
            ],
            out_specs=pl.BlockSpec((1, 1, tile_b), lambda i: (i, 0, 0)),
        ),
        compiler_params=pltpu.CompilerParams(
            dimension_semantics=("parallel",),   # megacore sharding on v7x
            vmem_limit_bytes=vmem_limit,
        ),
    )(inputs, tgt)

    # Rows past B (partial last block) are undefined -> slice before the mean.
    per_sample = per_tile.reshape(-1)[:B]
    if reduction:
        return jnp.mean(per_sample)              # divides by the true B
    return per_sample


def _reference(inputs, targets, num_classes, epsilon=0.1, reduction=True):
    log_probs = jax.nn.log_softmax(inputs.astype(jnp.float32), axis=1)
    one_hot = jax.nn.one_hot(targets, num_classes, dtype=jnp.float32)
    smoothed = (1.0 - epsilon) * one_hot + epsilon / num_classes
    loss = jnp.sum(-smoothed * log_probs, axis=1)
    return jnp.mean(loss) if reduction else loss


if __name__ == "__main__":
    num_classes = 32
    epsilon = 0.1
    key = jax.random.PRNGKey(0)

    # Case 1: small batch, single tile, reduction=True (matches the module).
    batch = 8
    k_logits, k_targets = jax.random.split(key)
    logits = jax.random.normal(k_logits, (batch, num_classes), dtype=jnp.float32)
    targets = jax.random.randint(k_targets, (batch,), 0, num_classes,
                                 dtype=jnp.int32)
    loss = cross_entropy_label_smooth(
        logits, targets, num_classes=num_classes, epsilon=epsilon, reduction=True)
    loss = jax.block_until_ready(loss)
    ref = _reference(logits, targets, num_classes, epsilon, reduction=True)
    assert jnp.allclose(loss, ref, atol=1e-4, rtol=1e-5), (loss, ref)

    # Case 2: batch not a multiple of 8 (single partial-friendly tile),
    # reduction=False (per-sample losses).
    batch2 = 10
    k1, k2 = jax.random.split(k_logits)
    logits2 = jax.random.normal(k1, (batch2, num_classes), dtype=jnp.float32)
    targets2 = jax.random.randint(k2, (batch2,), 0, num_classes, dtype=jnp.int32)
    loss2 = cross_entropy_label_smooth(
        logits2, targets2, num_classes=num_classes, epsilon=epsilon,
        reduction=False)
    loss2 = jax.block_until_ready(loss2)
    ref2 = _reference(logits2, targets2, num_classes, epsilon, reduction=False)
    assert loss2.shape == (batch2,)
    assert jnp.allclose(loss2, ref2, atol=1e-4, rtol=1e-5), (loss2, ref2)

    # Case 3: force a small tile so the grid has multiple steps
    # (exercises the pipelined multi-tile path + "parallel" batch axis +
    #  lane-dense (num_tiles, 1, tile_b) output).
    batch3 = 24
    k3, k4 = jax.random.split(k_targets)
    logits3 = jax.random.normal(k3, (batch3, num_classes), dtype=jnp.float32)
    targets3 = jax.random.randint(k4, (batch3,), 0, num_classes, dtype=jnp.int32)
    loss3 = cross_entropy_label_smooth(
        logits3, targets3, num_classes=num_classes, epsilon=epsilon,
        reduction=True, tile_b=8)
    loss3 = jax.block_until_ready(loss3)
    ref3 = _reference(logits3, targets3, num_classes, epsilon, reduction=True)
    assert jnp.allclose(loss3, ref3, atol=1e-4, rtol=1e-5), (loss3, ref3)

    print("KERNEL_OK")
</pallas_src>

<mosaic_0001>
module attributes {stable_mosaic.version = 11 : i64} {
  func.func @_ce_label_smooth_kernel(%arg0: i32, %arg1: memref<8x32xf32, #tpu.memory_space<vmem>>, %arg2: memref<8x1xi32, #tpu.memory_space<vmem>>, %arg3: memref<1x1x8xf32, #tpu.memory_space<vmem>>) attributes {dimension_semantics = [#tpu.dimension_semantics<parallel>], iteration_bounds = array<i64: 1>, scalar_prefetch = 0 : i64, scratch_operands = 0 : i64, tpu.core_type = #tpu.core_type<tc>, window_params = [{transform_indices = @transform_0, window_bounds = array<i64: 8, 32>}, {transform_indices = @transform_1, window_bounds = array<i64: 8, 1>}, {transform_indices = @transform_2, window_bounds = array<i64: 1, 1, 8>}]} {
    %c0 = arith.constant 0 : index
    %c0_0 = arith.constant 0 : index
    %0 = vector.load %arg1[%c0, %c0_0] : memref<8x32xf32, #tpu.memory_space<vmem>>, vector<8x32xf32>
    %cst = arith.constant dense<0xFF800000> : vector<8xf32>
    %1 = vector.multi_reduction <maximumf>, %0, %cst [1] : vector<8x32xf32> to vector<8xf32>
    %2 = vector.shape_cast %1 : vector<8xf32> to vector<8x1xf32>
    %3 = vector.broadcast %2 : vector<8x1xf32> to vector<8x32xf32>
    %4 = arith.subf %0, %3 : vector<8x32xf32>
    %5 = math.exp %4 : vector<8x32xf32>
    %cst_1 = arith.constant dense<0.000000e+00> : vector<8xf32>
    %6 = vector.multi_reduction <add>, %5, %cst_1 [1] : vector<8x32xf32> to vector<8xf32>
    %7 = vector.shape_cast %6 : vector<8xf32> to vector<8x1xf32>
    %8 = math.log %7 : vector<8x1xf32>
    %9 = arith.addf %8, %2 : vector<8x1xf32>
    %c0_2 = arith.constant 0 : index
    %c0_3 = arith.constant 0 : index
    %10 = vector.load %arg2[%c0_2, %c0_3] : memref<8x1xi32, #tpu.memory_space<vmem>>, vector<8x1xi32>
    %11 = tpu.iota {dimensions = array<i32: 1>} : vector<8x32xi32>
    %12 = vector.broadcast %10 : vector<8x1xi32> to vector<8x32xi32>
    %13 = arith.cmpi eq, %11, %12 : vector<8x32xi32>
    %cst_4 = arith.constant 0.903124988 : f32
    %cst_5 = arith.constant 3.125000e-03 : f32
    %14 = vector.broadcast %cst_4 : f32 to vector<8x32xf32>
    %15 = vector.broadcast %cst_5 : f32 to vector<8x32xf32>
    %16 = arith.select %13, %14, %15 : vector<8x32xi1>, vector<8x32xf32>
    %17 = arith.mulf %0, %16 : vector<8x32xf32>
    %cst_6 = arith.constant dense<0.000000e+00> : vector<8xf32>
    %18 = vector.multi_reduction <add>, %17, %cst_6 [1] : vector<8x32xf32> to vector<8xf32>
    %19 = vector.shape_cast %18 : vector<8xf32> to vector<8x1xf32>
    %20 = arith.subf %9, %19 : vector<8x1xf32>
    %21 = vector.shape_cast %20 : vector<8x1xf32> to vector<8xf32>
    %c0_7 = arith.constant 0 : index
    %c0_8 = arith.constant 0 : index
    %c0_9 = arith.constant 0 : index
    %22 = vector.load %arg3[%c0_7, %c0_8, %c0_9] : memref<1x1x8xf32, #tpu.memory_space<vmem>>, vector<1x1x8xf32>
    %23 = vector.shape_cast %22 : vector<1x1x8xf32> to vector<8xf32>
    %24 = vector.shape_cast %21 : vector<8xf32> to vector<1x1x8xf32>
    tpu.vector_store %arg3[%c0_7, %c0_8, %c0_9], %24 {strides = array<i32>} : memref<1x1x8xf32, #tpu.memory_space<vmem>>, vector<1x1x8xf32>,
    return
  }
  func.func @transform_0(%arg0: i32) -> (i32, i32) {
    %c0_i32 = arith.constant 0 : i32
    %c0_i32_0 = arith.constant 0 : i32
    return %arg0, %c0_i32 : i32, i32
  }
  func.func @transform_1(%arg0: i32) -> (i32, i32) {
    %c0_i32 = arith.constant 0 : i32
    %c0_i32_0 = arith.constant 0 : i32
    return %arg0, %c0_i32 : i32, i32
  }
  func.func @transform_2(%arg0: i32) -> (i32, i32, i32) {
    %c0_i32 = arith.constant 0 : i32
    %c0_i32_0 = arith.constant 0 : i32
    %c0_i32_1 = arith.constant 0 : i32
    return %arg0, %c0_i32, %c0_i32_0 : i32, i32, i32
  }
}

</mosaic_0001>

<bundles_post_ra>
// kernel: tpu_custom_call.1
= control target key start
LH: loop header
LB: loop body
LE: loop exit
PB: predicated region body
PF: predicated region fallthrough
CT: control target
= control target key end

     0   :  { %vm13_vm0 = vcmask 261120   ;;  %s132_s0 = inlined_call_operand.vmem [shape: f32[8,32], index: 0, kind: input, shape index: {}]   ;;  %s133_s1 = inlined_call_operand.vmem [shape: s32[8,1], index: 1, kind: input, shape index: {}]   ;;  %s134_s2 = inlined_call_operand.hbm [shape: f32[1,1,8], index: 2, kind: output, shape index: {}]  }
   0x1   :  { %v12_v0 = vld [vmem:[%s132_s0] sm:$0xff] }
   0x2   :  { %7 = vsyncpa [#allocation3], 0  ;;  %v14_v1 = vsel %vm13_vm0, %v12_v0, -inf  ;;  %v93_v2 = vmov 0   ;;  %v26_v3 = vld [vmem:[%s133_s1] sm:$0xff]  ;;  %v27_v6 = vlaneseq  ;;  %s95_s0 = smov [#allocation2]  }
   0x3   :  { %64 = vset.pattern.permute.xlu0 %v93_v2  ;;  %v94_v10 = vmov 0.003125   ;;  %s53_s1 = sshll.u32 %s95_s0, 4  ;;  %vm45_vm2 = vcmask 57344   ;;  %s54_s1 = int_to_ptr.vmem [resolvable:$true] %s53_s1 }
   0x4   :  { %15 = vmax.xlane.f32.xlu0 %v14_v1  ;;  %v28_v8 = vand.u32 127, %v27_v6  ;;  %v41_v17 = vshrl.u32 %v27_v6, 7  ;;  %s69_s13 = scalar_lea.vmem %s54_s1, 16  ;;  %s73_s14 = scalar_lea.vmem %s54_s1, 32 }
   0x5   :  { %p70_p0 = scmp.ne.s32.totalorder %s54_s1, %s69_s13  ;;  %p74_p1 = scmp.lt.s32.totalorder %s54_s1, %s54_s1 }
   0x6   :  { %v42_v22 = vsub.s32 %v28_v8, %v41_v17  ;;  %p75_p2 = scmp.lt.s32.totalorder %s73_s14, %s69_s13 }
   0x8   :  { %p76_p3 = por %p75_p2, %p74_p1 }
   0xa   :  { %p77_p4 = pnand %p76_p3, %p70_p0 }
  0x1a   :  { %30 = vperm.xlu0 %64, %v26_v3  }
  0x91   :  { %v16_v4 = vpop.xlane.xlu0 %15 }
  0x92   :  { %v17_v5 = vsub.f32 %v12_v0, %v16_v4 }
  0x94   :  { %v18_v7 = vmul.f32 1.442695, %v17_v5 }
  0x96   :  { %65 = vpow2.f32 %v18_v7 }
  0x99   :  { %v31_v9 = vpop.permute.xlu0 %30 }
  0x9a   :  { %vm32_vm1 = vcmp.eq.s32.totalorder %v28_v8, %v31_v9 }
  0x9b   :  { %v33_v11 = vsel %vm32_vm1, 0.903125, %v94_v10 }
  0x9c   :  { %v34_v12 = vmul.f32 %v33_v11, %v12_v0 }
  0x9e   :  { %v35_v15 = vsel %vm13_vm0, %v34_v12, 0.0 }
  0xa0   :  { %v66_v13 = vpop.eup %65 }
  0xa1   :  { %v20_v14 = vsel %vm13_vm0, %v66_v13, 0.0 }
  0xa2   :  { %21 = vadd.xlane.f32.xlu1 %v20_v14 }
  0xa6   :  { %36 = vadd.xlane.f32.xlu1 %v35_v15 }
 0x12f   :  { %v22_v16 = vpop.xlane.xlu1 %21 }
 0x130   :  { %67 = vlog2.f32 %v22_v16 }
 0x133   :  { %v37_v20 = vpop.xlane.xlu1 %36 }
 0x13a   :  { %v68_v18 = vpop.eup %67 }
 0x13b   :  { %v24_v19 = vmul.f32 0.6931472, %v68_v18 }
 0x13d   :  { %v25_v21 = vadd.f32 %v24_v19, %v16_v4 }
 0x13f   :  { %v38_v23 = vsub.f32 %v25_v21, %v37_v20 }
 0x141   :  { %v43_v24 = vrot.slane %v38_v23, %v42_v22 }
 0x143   :  { %46 = vst.msk [vmem:[#allocation2] sm:$0x1] %vm45_vm2, %v43_v24 }
 0x144   :  { %80 = shalt.err (!%p77_p4)
}
 0x145   :  { %s81_s17 = scalar_lea.hbm %s134_s2, 16 }
 0x146   :  { %p82_p5 = scmp.ne.s32.totalorder %s134_s2, %s81_s17  ;;  %p85_p6 = scmp.lt.u32.totalorder %s81_s17, %s134_s2 }
 0x148   :  { %p87_p7 = pnand %p85_p6, %p82_p5 }
 0x14a   :  { %90 = shalt.err (!%p87_p7)
}
 0x14b   :  { %56 = dma.vmem_to_hbm [thread:$0]  %s54_s1, 16, %s134_s2, [#allocation3]  }
 0x14c   :  { %91 = dma.done.wait [#allocation3], 16  }
 0x14d   :  { %92 = vsyncadd [#allocation3], 4294967280 }
 0x14e   :  { %60 = vsyncpa [#allocation3], 1 }

</bundles_post_ra>
